<compile_context>
chip_gen: v6e
topology: v6e:2x2x1
jax: 0.10.0
libtpu: 0.0.40
codegen_flags: <defaults>
</compile_context>

<pallas_src>
import math

import jax
import jax.numpy as jnp
from jax import lax
from jax.experimental import pallas as pl
from jax.experimental.pallas import tpu as pltpu


def _pick_q_tile(seq_len):
    """Largest query tile (multiple of 8) dividing seq_len, capped at 256."""
    if seq_len <= 256:
        return seq_len
    for t in (256, 128, 64, 32, 16, 8):
        if seq_len % t == 0:
            return t
    return seq_len


def _make_kernel(*, scale, num_heads, head_dim, seq_len, tq, with_probs,
                 mm_dtype, approx_recip):
    """Kernel for grid = (B, S // Tq).

    Ref layout:
      hid_ref:  (1, S, H)      full hidden states of this batch element
      wq_ref:   (H, H)         transposed Q weight (grid-invariant, resident)
      bq_ref:   (1, H)         Q bias
      wkv_ref:  (H, 2H)        transposed fused K|V weight (grid-invariant)
      bkv_ref:  (1, 2H)        fused K|V bias
      mask_ref: (1, 1, S)      additive attention mask (broadcast over rows)
      ctx_ref:  (1, Tq, H)     context output tile (lane-dense)
      probs_ref:(1, nh, Tq, S) attention probabilities (only if with_probs)
      q_scr:    VMEM (Tq, H)   pre-scaled Q projection for this tile
      kv_scr:   VMEM (S, 2H)   K|V projection, persists across query tiles
    """
    H = num_heads * head_dim

    def kernel(hid_ref, wq_ref, bq_ref, wkv_ref, bkv_ref, mask_ref, ctx_ref,
               *rest):
        if with_probs:
            probs_ref, q_scr, kv_scr = rest
        else:
            probs_ref = None
            q_scr, kv_scr = rest

        qi = pl.program_id(1)

        # K/V projection for the whole sequence: once per batch element; the
        # result lives in VMEM scratch across this batch's query-tile steps.
        @pl.when(qi == 0)
        def _project_kv():
            x = hid_ref[0]                                      # [S, H]
            kv = jnp.dot(x.astype(mm_dtype), wkv_ref[...],
                         preferred_element_type=jnp.float32) + bkv_ref[...]
            kv_scr[...] = kv.astype(kv_scr.dtype)

        # Q projection for this query tile only; 1/sqrt(D) folded in once.
        row0 = pl.multiple_of(qi * tq, tq)
        x_q = hid_ref[0, pl.ds(row0, tq), :]                    # [Tq, H]
        q = jnp.dot(x_q.astype(mm_dtype), wq_ref[...],
                    preferred_element_type=jnp.float32) + bq_ref[...]
        q_scr[...] = (q * scale).astype(q_scr.dtype)

        # Mask broadcast hoisted out of the per-head loop.
        mask_b = jnp.broadcast_to(mask_ref[0], (tq, seq_len))   # [Tq, S]

        ctx_parts = []
        for hd in range(num_heads):
            lo = hd * head_dim
            q_h = q_scr[:, lo:lo + head_dim]                    # [Tq, D]
            k_h = kv_scr[:, lo:lo + head_dim]                   # [S, D]
            v_h = kv_scr[:, H + lo:H + lo + head_dim]           # [S, D]

            # Contract on D directly: no k.T (no per-head XLU transpose).
            scores = lax.dot_general(
                q_h, k_h, (((1,), (1,)), ((), ())),
                preferred_element_type=jnp.float32)             # [Tq, S]
            scores = scores + mask_b

            # Numerically-stable softmax along keys (kept in f32 always).
            m = jnp.max(scores, axis=-1, keepdims=True)
            e = jnp.exp(scores - m)
            denom = jnp.sum(e, axis=-1, keepdims=True)
            probs = e * pl.reciprocal(denom, approx=approx_recip)

            if with_probs:
                # Lane-dense store: last dim is S.
                probs_ref[0, hd] = probs.astype(probs_ref.dtype)

            ctx_parts.append(
                jnp.dot(probs.astype(mm_dtype), v_h,
                        preferred_element_type=jnp.float32))    # [Tq, D]

        # Single lane-dense [Tq, H] store instead of nh masked D-wide stores.
        ctx_ref[0] = jnp.concatenate(ctx_parts, axis=-1).astype(ctx_ref.dtype)

    return kernel


def bert_linear_block(hidden_states, attention_mask, params, num_heads,
                      output_attentions=True, use_bf16=False,
                      approx_recip=False, probs_dtype=jnp.float32):
    """Pallas implementation of BERTLinearBlock.forward.

    hidden_states:  [B, S, H] float32
    attention_mask: [B, 1, 1, S] float32 (additive, broadcast over heads/rows)
    params: torch-convention weights:
        'wq','wk','wv': [H, H]  (out_features, in_features)
        'bq','bk','bv': [H]
    Returns (context [B, S, H], attention_probs [B, nh, S, S]) or
    (context,) when output_attentions=False.
    """
    B, S, H = hidden_states.shape
    D = H // num_heads
    scale = 1.0 / math.sqrt(D)
    tq = _pick_q_tile(S)
    n_q = S // tq

    mm_dtype = jnp.bfloat16 if use_bf16 else jnp.float32
    w_dtype = mm_dtype        # bf16-at-rest weights when use_bf16
    scr_dtype = mm_dtype      # bf16 K/V + Q scratch when use_bf16

    # nn.Linear computes x @ W.T + b.  Q weight separate (query tile matmul);
    # K|V fused into one [H, 2H] slab so the full-sequence projection is a
    # single lane-dense matmul per batch element.  Column order inside each
    # group is already head-major (torch reshape of the output features).
    wq = jnp.transpose(params["wq"]).astype(w_dtype)                    # [H, H]
    bq = params["bq"].reshape(1, H).astype(jnp.float32)                 # [1, H]
    wkv = jnp.concatenate(
        [jnp.transpose(params["wk"]), jnp.transpose(params["wv"])],
        axis=1).astype(w_dtype)                                         # [H, 2H]
    bkv = jnp.concatenate(
        [params["bk"], params["bv"]]).reshape(1, 2 * H).astype(jnp.float32)

    mask = attention_mask.reshape(B, 1, S).astype(jnp.float32)

    kernel = _make_kernel(scale=scale, num_heads=num_heads, head_dim=D,
                          seq_len=S, tq=tq, with_probs=output_attentions,
                          mm_dtype=mm_dtype, approx_recip=approx_recip)

    in_specs = [
        pl.BlockSpec((1, S, H), lambda b, qi: (b, 0, 0)),       # hidden
        pl.BlockSpec((H, H), lambda b, qi: (0, 0)),             # wq (resident)
        pl.BlockSpec((1, H), lambda b, qi: (0, 0)),             # bq
        pl.BlockSpec((H, 2 * H), lambda b, qi: (0, 0)),         # wkv (resident)
        pl.BlockSpec((1, 2 * H), lambda b, qi: (0, 0)),         # bkv
        pl.BlockSpec((1, 1, S), lambda b, qi: (b, 0, 0)),       # mask
    ]
    ctx_spec = pl.BlockSpec((1, tq, H), lambda b, qi: (b, qi, 0))

    if output_attentions:
        out_shape = (
            jax.ShapeDtypeStruct((B, S, H), jnp.float32),
            jax.ShapeDtypeStruct((B, num_heads, S, S), probs_dtype),
        )
        out_specs = [
            ctx_spec,
            pl.BlockSpec((1, num_heads, tq, S), lambda b, qi: (b, 0, qi, 0)),
        ]
    else:
        out_shape = jax.ShapeDtypeStruct((B, S, H), jnp.float32)
        out_specs = ctx_spec

    scratch_shapes = [
        pltpu.VMEM((tq, H), scr_dtype),       # pre-scaled Q for this tile
        pltpu.VMEM((S, 2 * H), scr_dtype),    # K|V for this batch element
    ]

    # Per-step VMEM estimate: BlockSpec tiles (double-buffered where pipelined),
    # resident weights, persistent scratches AND in-kernel temporaries
    # (projection results + a few live (Tq, S) f32 arrays per head).
    wbytes = jnp.dtype(w_dtype).itemsize
    sbytes = jnp.dtype(scr_dtype).itemsize
    pbytes = jnp.dtype(probs_dtype).itemsize
    est = (2 * S * H * 4                              # hidden block
           + (H * H + H * 2 * H) * wbytes             # resident weights
           + 3 * H * 4                                # biases
           + 2 * S * 4                                # mask
           + 2 * tq * H * 4                           # ctx output block
           + (tq * H + S * 2 * H) * sbytes            # scratches
           + (tq * H + S * 2 * H) * 4                 # projection temporaries
           + 4 * tq * S * 4)                          # scores/exp/probs temps
    if output_attentions:
        est += 2 * num_heads * tq * S * pbytes        # probs output block
    vmem_limit = int(min(48 * 1024 * 1024,
                         max(16 * 1024 * 1024, int(1.3 * est))))

    outs = pl.pallas_call(
        kernel,
        out_shape=out_shape,
        grid_spec=pltpu.PrefetchScalarGridSpec(
            num_scalar_prefetch=0,
            grid=(B, n_q),
            in_specs=in_specs,
            out_specs=out_specs,
            scratch_shapes=scratch_shapes,
        ),
        compiler_params=pltpu.CompilerParams(
            # Batch axis is parallel (megacore); q-tile axis must stay
            # "arbitrary" because the K/V scratch persists across its steps.
            dimension_semantics=("parallel", "arbitrary"),
            vmem_limit_bytes=vmem_limit),
    )(hidden_states.astype(jnp.float32), wq, bq, wkv, bkv, mask)

    if output_attentions:
        ctx, probs = outs
        return ctx, probs
    return (outs,)


def _reference(hidden_states, attention_mask, params, num_heads):
    """Pure-JAX reference mirroring the PyTorch forward."""
    B, S, H = hidden_states.shape
    D = H // num_heads

    def lin(x, w, b):
        return x @ w.T + b

    def split_heads(x):
        return x.reshape(B, S, num_heads, D).transpose(0, 2, 1, 3)

    q = split_heads(lin(hidden_states, params["wq"], params["bq"]))
    k = split_heads(lin(hidden_states, params["wk"], params["bk"]))
    v = split_heads(lin(hidden_states, params["wv"], params["bv"]))

    scores = jnp.einsum("bhqd,bhkd->bhqk", q, k) / math.sqrt(D)
    scores = scores + attention_mask  # [B,1,1,S] broadcast
    probs = jax.nn.softmax(scores, axis=-1)
    ctx = jnp.einsum("bhqk,bhkd->bhqd", probs, v)
    ctx = ctx.transpose(0, 2, 1, 3).reshape(B, S, H)
    return ctx, probs


if __name__ == "__main__":
    # Small shapes consistent with the module: hidden_size=32, heads=4, seq=8.
    B, S, H, NH = 2, 8, 32, 4
    key = jax.random.PRNGKey(0)
    kx, km, k1, k2, k3, k4, k5, k6 = jax.random.split(key, 8)

    hidden_states = jax.random.normal(kx, (B, S, H), dtype=jnp.float32)
    # Standard BERT additive mask: 0 for keep, -10000 for masked positions.
    keep = (jax.random.uniform(km, (B, 1, 1, S)) > 0.2).astype(jnp.float32)
    attention_mask = (1.0 - keep) * -10000.0

    # NOTE: the PyTorch __init__ zero-inits all weights/biases (which would make
    # the forward trivially constant); use deterministic small random params of
    # the same shapes so the kernel computes something non-degenerate.
    params = {
        "wq": jax.random.normal(k1, (H, H), dtype=jnp.float32) * 0.05,
        "wk": jax.random.normal(k2, (H, H), dtype=jnp.float32) * 0.05,
        "wv": jax.random.normal(k3, (H, H), dtype=jnp.float32) * 0.05,
        "bq": jax.random.normal(k4, (H,), dtype=jnp.float32) * 0.01,
        "bk": jax.random.normal(k5, (H,), dtype=jnp.float32) * 0.01,
        "bv": jax.random.normal(k6, (H,), dtype=jnp.float32) * 0.01,
    }

    # Path 1: with attention probs (matches output_attentions=True).
    ctx, probs = bert_linear_block(hidden_states, attention_mask, params, NH,
                                   output_attentions=True)
    jax.block_until_ready(ctx)
    jax.block_until_ready(probs)

    ref_ctx, ref_probs = _reference(hidden_states, attention_mask, params, NH)
    assert jnp.allclose(ctx, ref_ctx, atol=1e-5, rtol=1e-5), "context mismatch"
    assert jnp.allclose(probs, ref_probs, atol=1e-5, rtol=1e-5), "probs mismatch"

    # Path 2: context-only (output_attentions=False) — no (B, nh, S, S) output.
    (ctx_only,) = bert_linear_block(hidden_states, attention_mask, params, NH,
                                    output_attentions=False)
    jax.block_until_ready(ctx_only)
    assert jnp.allclose(ctx_only, ref_ctx, atol=1e-5, rtol=1e-5), \
        "context-only mismatch"

    print("KERNEL_OK")
</pallas_src>

<mosaic_0001>
module attributes {stable_mosaic.version = 11 : i64} {
  func.func @kernel(%arg0: i32, %arg1: i32, %arg2: memref<1x8x32xf32, #tpu.memory_space<vmem>>, %arg3: memref<32x32xf32, #tpu.memory_space<vmem>>, %arg4: memref<1x32xf32, #tpu.memory_space<vmem>>, %arg5: memref<32x64xf32, #tpu.memory_space<vmem>>, %arg6: memref<1x64xf32, #tpu.memory_space<vmem>>, %arg7: memref<1x1x8xf32, #tpu.memory_space<vmem>>, %arg8: memref<1x8x32xf32, #tpu.memory_space<vmem>>, %arg9: memref<1x4x8x8xf32, #tpu.memory_space<vmem>>, %arg10: memref<8x32xf32, #tpu.memory_space<vmem>>, %arg11: memref<8x64xf32, #tpu.memory_space<vmem>>) attributes {dimension_semantics = [#tpu.dimension_semantics<parallel>, #tpu.dimension_semantics<arbitrary>], iteration_bounds = array<i64: 2, 1>, scalar_prefetch = 0 : i64, scratch_operands = 2 : i64, tpu.core_type = #tpu.core_type<tc>, window_params = [{transform_indices = @transform_0, window_bounds = array<i64: 1, 8, 32>}, {pipeline_mode = #tpu.pipeline_mode<synchronous>, transform_indices = @transform_1, window_bounds = array<i64: 32, 32>}, {pipeline_mode = #tpu.pipeline_mode<synchronous>, transform_indices = @transform_2, window_bounds = array<i64: 1, 32>}, {pipeline_mode = #tpu.pipeline_mode<synchronous>, transform_indices = @transform_3, window_bounds = array<i64: 32, 64>}, {pipeline_mode = #tpu.pipeline_mode<synchronous>, transform_indices = @transform_4, window_bounds = array<i64: 1, 64>}, {transform_indices = @transform_5, window_bounds = array<i64: 1, 1, 8>}, {transform_indices = @transform_6, window_bounds = array<i64: 1, 8, 32>}, {transform_indices = @transform_7, window_bounds = array<i64: 1, 4, 8, 8>}]} {
    %c0_i32 = arith.constant 0 : i32
    %0 = arith.cmpi eq, %arg1, %c0_i32 : i32
    %1 = arith.extui %0 : i1 to i32
    %c0_i32_0 = arith.constant 0 : i32
    %2 = arith.cmpi ne, %1, %c0_i32_0 : i32
    scf.if %2 {
      %c0_61 = arith.constant 0 : index
      %c0_62 = arith.constant 0 : index
      %c0_63 = arith.constant 0 : index
      %100 = vector.load %arg2[%c0_61, %c0_62, %c0_63] : memref<1x8x32xf32, #tpu.memory_space<vmem>>, vector<1x8x32xf32>
      %101 = vector.shape_cast %100 : vector<1x8x32xf32> to vector<8x32xf32>
      %c0_64 = arith.constant 0 : index
      %c0_65 = arith.constant 0 : index
      %102 = vector.load %arg5[%c0_64, %c0_65] : memref<32x64xf32, #tpu.memory_space<vmem>>, vector<32x64xf32>
      %cst_66 = arith.constant dense<0.000000e+00> : vector<8x64xf32>
      %103 = tpu.matmul %101, %102, %cst_66 {dimension_numbers = #tpu.dot_dimension_numbers<[1], [0], [0], [1], [0, 0, 1, 1], [], []>} : vector<8x32xf32>, vector<32x64xf32>, vector<8x64xf32> -> vector<8x64xf32>
      %c0_67 = arith.constant 0 : index
      %c0_68 = arith.constant 0 : index
      %104 = vector.load %arg6[%c0_67, %c0_68] : memref<1x64xf32, #tpu.memory_space<vmem>>, vector<1x64xf32>
      %105 = vector.broadcast %104 : vector<1x64xf32> to vector<8x64xf32>
      %106 = arith.addf %103, %105 : vector<8x64xf32>
      %c0_69 = arith.constant 0 : index
      %c0_70 = arith.constant 0 : index
      %107 = vector.load %arg11[%c0_69, %c0_70] : memref<8x64xf32, #tpu.memory_space<vmem>>, vector<8x64xf32>
      tpu.vector_store %arg11[%c0_69, %c0_70], %106 {strides = array<i32>} : memref<8x64xf32, #tpu.memory_space<vmem>>, vector<8x64xf32>,
    } else {
    }
    %c8_i32 = arith.constant 8 : i32
    %3 = arith.muli %arg1, %c8_i32 : i32
    %4 = tpu.assume_multiple %3, 8 : i32
    %c0 = arith.constant 0 : index
    %5 = arith.index_cast %4 : i32 to index
    %c0_1 = arith.constant 0 : index
    %6 = vector.load %arg2[%c0, %5, %c0_1] : memref<1x8x32xf32, #tpu.memory_space<vmem>>, vector<1x8x32xf32>
    %7 = vector.shape_cast %6 : vector<1x8x32xf32> to vector<8x32xf32>
    %c0_2 = arith.constant 0 : index
    %c0_3 = arith.constant 0 : index
    %8 = vector.load %arg3[%c0_2, %c0_3] : memref<32x32xf32, #tpu.memory_space<vmem>>, vector<32x32xf32>
    %cst = arith.constant dense<0.000000e+00> : vector<8x32xf32>
    %9 = tpu.matmul %7, %8, %cst {dimension_numbers = #tpu.dot_dimension_numbers<[1], [0], [0], [1], [0, 0, 1, 1], [], []>} : vector<8x32xf32>, vector<32x32xf32>, vector<8x32xf32> -> vector<8x32xf32>
    %c0_4 = arith.constant 0 : index
    %c0_5 = arith.constant 0 : index
    %10 = vector.load %arg4[%c0_4, %c0_5] : memref<1x32xf32, #tpu.memory_space<vmem>>, vector<1x32xf32>
    %11 = vector.broadcast %10 : vector<1x32xf32> to vector<8x32xf32>
    %12 = arith.addf %9, %11 : vector<8x32xf32>
    %cst_6 = arith.constant 0.353553385 : f32
    %13 = vector.broadcast %cst_6 : f32 to vector<8x32xf32>
    %14 = arith.mulf %12, %13 : vector<8x32xf32>
    %c0_7 = arith.constant 0 : index
    %c0_8 = arith.constant 0 : index
    %15 = vector.load %arg10[%c0_7, %c0_8] : memref<8x32xf32, #tpu.memory_space<vmem>>, vector<8x32xf32>
    tpu.vector_store %arg10[%c0_7, %c0_8], %14 {strides = array<i32>} : memref<8x32xf32, #tpu.memory_space<vmem>>, vector<8x32xf32>,
    %c0_9 = arith.constant 0 : index
    %c0_10 = arith.constant 0 : index
    %c0_11 = arith.constant 0 : index
    %16 = vector.load %arg7[%c0_9, %c0_10, %c0_11] : memref<1x1x8xf32, #tpu.memory_space<vmem>>, vector<1x1x8xf32>
    %17 = vector.shape_cast %16 : vector<1x1x8xf32> to vector<1x8xf32>
    %18 = vector.shape_cast %17 : vector<1x8xf32> to vector<1x8xf32>
    %19 = vector.broadcast %18 : vector<1x8xf32> to vector<8x8xf32>
    %c0_12 = arith.constant 0 : index
    %c0_13 = arith.constant 0 : index
    %20 = vector.load %arg10[%c0_12, %c0_13] : memref<8x32xf32, #tpu.memory_space<vmem>>, vector<8x8xf32>
    %c0_14 = arith.constant 0 : index
    %c0_15 = arith.constant 0 : index
    %21 = vector.load %arg11[%c0_14, %c0_15] : memref<8x64xf32, #tpu.memory_space<vmem>>, vector<8x8xf32>
    %c0_16 = arith.constant 0 : index
    %c32 = arith.constant 32 : index
    %22 = vector.load %arg11[%c0_16, %c32] : memref<8x64xf32, #tpu.memory_space<vmem>>, vector<8x8xf32>
    %cst_17 = arith.constant dense<0.000000e+00> : vector<8x8xf32>
    %23 = tpu.matmul %20, %21, %cst_17 {dimension_numbers = #tpu.dot_dimension_numbers<[1], [1], [0], [0], [0, 0, 1, 0], [], []>} : vector<8x8xf32>, vector<8x8xf32>, vector<8x8xf32> -> vector<8x8xf32>
    %24 = arith.addf %23, %19 : vector<8x8xf32>
    %cst_18 = arith.constant dense<0xFF800000> : vector<8xf32>
    %25 = vector.multi_reduction <maximumf>, %24, %cst_18 [1] : vector<8x8xf32> to vector<8xf32>
    %26 = vector.shape_cast %25 : vector<8xf32> to vector<8x1xf32>
    %27 = vector.broadcast %26 : vector<8x1xf32> to vector<8x8xf32>
    %28 = arith.subf %24, %27 : vector<8x8xf32>
    %29 = math.exp %28 : vector<8x8xf32>
    %cst_19 = arith.constant dense<0.000000e+00> : vector<8xf32>
    %30 = vector.multi_reduction <add>, %29, %cst_19 [1] : vector<8x8xf32> to vector<8xf32>
    %31 = vector.shape_cast %30 : vector<8xf32> to vector<8x1xf32>
    %32 = tpu.reciprocal %31 : vector<8x1xf32> -> vector<8x1xf32>
    %33 = vector.broadcast %32 : vector<8x1xf32> to vector<8x8xf32>
    %34 = arith.mulf %29, %33 : vector<8x8xf32>
    %c0_20 = arith.constant 0 : index
    %c0_21 = arith.constant 0 : index
    %c0_22 = arith.constant 0 : index
    %c0_23 = arith.constant 0 : index
    %35 = vector.load %arg9[%c0_20, %c0_21, %c0_22, %c0_23] : memref<1x4x8x8xf32, #tpu.memory_space<vmem>>, vector<1x1x8x8xf32>
    %36 = vector.shape_cast %35 : vector<1x1x8x8xf32> to vector<8x8xf32>
    %37 = vector.shape_cast %34 : vector<8x8xf32> to vector<1x1x8x8xf32>
    tpu.vector_store %arg9[%c0_20, %c0_21, %c0_22, %c0_23], %37 {strides = array<i32>} : memref<1x4x8x8xf32, #tpu.memory_space<vmem>>, vector<1x1x8x8xf32>,
    %cst_24 = arith.constant dense<0.000000e+00> : vector<8x8xf32>
    %38 = tpu.matmul %34, %22, %cst_24 {dimension_numbers = #tpu.dot_dimension_numbers<[1], [0], [0], [1], [0, 0, 1, 1], [], []>} : vector<8x8xf32>, vector<8x8xf32>, vector<8x8xf32> -> vector<8x8xf32>
    %c0_25 = arith.constant 0 : index
    %c8 = arith.constant 8 : index
    %39 = vector.load %arg10[%c0_25, %c8] : memref<8x32xf32, #tpu.memory_space<vmem>>, vector<8x8xf32>
    %c0_26 = arith.constant 0 : index
    %c8_27 = arith.constant 8 : index
    %40 = vector.load %arg11[%c0_26, %c8_27] : memref<8x64xf32, #tpu.memory_space<vmem>>, vector<8x8xf32>
    %c0_28 = arith.constant 0 : index
    %c40 = arith.constant 40 : index
    %41 = vector.load %arg11[%c0_28, %c40] : memref<8x64xf32, #tpu.memory_space<vmem>>, vector<8x8xf32>
    %cst_29 = arith.constant dense<0.000000e+00> : vector<8x8xf32>
    %42 = tpu.matmul %39, %40, %cst_29 {dimension_numbers = #tpu.dot_dimension_numbers<[1], [1], [0], [0], [0, 0, 1, 0], [], []>} : vector<8x8xf32>, vector<8x8xf32>, vector<8x8xf32> -> vector<8x8xf32>
    %43 = arith.addf %42, %19 : vector<8x8xf32>
    %cst_30 = arith.constant dense<0xFF800000> : vector<8xf32>
    %44 = vector.multi_reduction <maximumf>, %43, %cst_30 [1] : vector<8x8xf32> to vector<8xf32>
    %45 = vector.shape_cast %44 : vector<8xf32> to vector<8x1xf32>
    %46 = vector.broadcast %45 : vector<8x1xf32> to vector<8x8xf32>
    %47 = arith.subf %43, %46 : vector<8x8xf32>
    %48 = math.exp %47 : vector<8x8xf32>
    %cst_31 = arith.constant dense<0.000000e+00> : vector<8xf32>
    %49 = vector.multi_reduction <add>, %48, %cst_31 [1] : vector<8x8xf32> to vector<8xf32>
    %50 = vector.shape_cast %49 : vector<8xf32> to vector<8x1xf32>
    %51 = tpu.reciprocal %50 : vector<8x1xf32> -> vector<8x1xf32>
    %52 = vector.broadcast %51 : vector<8x1xf32> to vector<8x8xf32>
    %53 = arith.mulf %48, %52 : vector<8x8xf32>
    %c0_32 = arith.constant 0 : index
    %c1 = arith.constant 1 : index
    %c0_33 = arith.constant 0 : index
    %c0_34 = arith.constant 0 : index
    %54 = vector.load %arg9[%c0_32, %c1, %c0_33, %c0_34] : memref<1x4x8x8xf32, #tpu.memory_space<vmem>>, vector<1x1x8x8xf32>
    %55 = vector.shape_cast %54 : vector<1x1x8x8xf32> to vector<8x8xf32>
    %56 = vector.shape_cast %53 : vector<8x8xf32> to vector<1x1x8x8xf32>
    tpu.vector_store %arg9[%c0_32, %c1, %c0_33, %c0_34], %56 {strides = array<i32>} : memref<1x4x8x8xf32, #tpu.memory_space<vmem>>, vector<1x1x8x8xf32>,
    %cst_35 = arith.constant dense<0.000000e+00> : vector<8x8xf32>
    %57 = tpu.matmul %53, %41, %cst_35 {dimension_numbers = #tpu.dot_dimension_numbers<[1], [0], [0], [1], [0, 0, 1, 1], [], []>} : vector<8x8xf32>, vector<8x8xf32>, vector<8x8xf32> -> vector<8x8xf32>
    %c0_36 = arith.constant 0 : index
    %c16 = arith.constant 16 : index
    %58 = vector.load %arg10[%c0_36, %c16] : memref<8x32xf32, #tpu.memory_space<vmem>>, vector<8x8xf32>
    %c0_37 = arith.constant 0 : index
    %c16_38 = arith.constant 16 : index
    %59 = vector.load %arg11[%c0_37, %c16_38] : memref<8x64xf32, #tpu.memory_space<vmem>>, vector<8x8xf32>
    %c0_39 = arith.constant 0 : index
    %c48 = arith.constant 48 : index
    %60 = vector.load %arg11[%c0_39, %c48] : memref<8x64xf32, #tpu.memory_space<vmem>>, vector<8x8xf32>
    %cst_40 = arith.constant dense<0.000000e+00> : vector<8x8xf32>
    %61 = tpu.matmul %58, %59, %cst_40 {dimension_numbers = #tpu.dot_dimension_numbers<[1], [1], [0], [0], [0, 0, 1, 0], [], []>} : vector<8x8xf32>, vector<8x8xf32>, vector<8x8xf32> -> vector<8x8xf32>
    %62 = arith.addf %61, %19 : vector<8x8xf32>
    %cst_41 = arith.constant dense<0xFF800000> : vector<8xf32>
    %63 = vector.multi_reduction <maximumf>, %62, %cst_41 [1] : vector<8x8xf32> to vector<8xf32>
    %64 = vector.shape_cast %63 : vector<8xf32> to vector<8x1xf32>
    %65 = vector.broadcast %64 : vector<8x1xf32> to vector<8x8xf32>
    %66 = arith.subf %62, %65 : vector<8x8xf32>
    %67 = math.exp %66 : vector<8x8xf32>
    %cst_42 = arith.constant dense<0.000000e+00> : vector<8xf32>
    %68 = vector.multi_reduction <add>, %67, %cst_42 [1] : vector<8x8xf32> to vector<8xf32>
    %69 = vector.shape_cast %68 : vector<8xf32> to vector<8x1xf32>
    %70 = tpu.reciprocal %69 : vector<8x1xf32> -> vector<8x1xf32>
    %71 = vector.broadcast %70 : vector<8x1xf32> to vector<8x8xf32>
    %72 = arith.mulf %67, %71 : vector<8x8xf32>
    %c0_43 = arith.constant 0 : index
    %c2 = arith.constant 2 : index
    %c0_44 = arith.constant 0 : index
    %c0_45 = arith.constant 0 : index
    %73 = vector.load %arg9[%c0_43, %c2, %c0_44, %c0_45] : memref<1x4x8x8xf32, #tpu.memory_space<vmem>>, vector<1x1x8x8xf32>
    %74 = vector.shape_cast %73 : vector<1x1x8x8xf32> to vector<8x8xf32>
    %75 = vector.shape_cast %72 : vector<8x8xf32> to vector<1x1x8x8xf32>
    tpu.vector_store %arg9[%c0_43, %c2, %c0_44, %c0_45], %75 {strides = array<i32>} : memref<1x4x8x8xf32, #tpu.memory_space<vmem>>, vector<1x1x8x8xf32>,
    %cst_46 = arith.constant dense<0.000000e+00> : vector<8x8xf32>
    %76 = tpu.matmul %72, %60, %cst_46 {dimension_numbers = #tpu.dot_dimension_numbers<[1], [0], [0], [1], [0, 0, 1, 1], [], []>} : vector<8x8xf32>, vector<8x8xf32>, vector<8x8xf32> -> vector<8x8xf32>
    %c0_47 = arith.constant 0 : index
    %c24 = arith.constant 24 : index
    %77 = vector.load %arg10[%c0_47, %c24] : memref<8x32xf32, #tpu.memory_space<vmem>>, vector<8x8xf32>
    %c0_48 = arith.constant 0 : index
    %c24_49 = arith.constant 24 : index
    %78 = vector.load %arg11[%c0_48, %c24_49] : memref<8x64xf32, #tpu.memory_space<vmem>>, vector<8x8xf32>
    %c0_50 = arith.constant 0 : index
    %c56 = arith.constant 56 : index
    %79 = vector.load %arg11[%c0_50, %c56] : memref<8x64xf32, #tpu.memory_space<vmem>>, vector<8x8xf32>
    %cst_51 = arith.constant dense<0.000000e+00> : vector<8x8xf32>
    %80 = tpu.matmul %77, %78, %cst_51 {dimension_numbers = #tpu.dot_dimension_numbers<[1], [1], [0], [0], [0, 0, 1, 0], [], []>} : vector<8x8xf32>, vector<8x8xf32>, vector<8x8xf32> -> vector<8x8xf32>
    %81 = arith.addf %80, %19 : vector<8x8xf32>
    %cst_52 = arith.constant dense<0xFF800000> : vector<8xf32>
    %82 = vector.multi_reduction <maximumf>, %81, %cst_52 [1] : vector<8x8xf32> to vector<8xf32>
    %83 = vector.shape_cast %82 : vector<8xf32> to vector<8x1xf32>
    %84 = vector.broadcast %83 : vector<8x1xf32> to vector<8x8xf32>
    %85 = arith.subf %81, %84 : vector<8x8xf32>
    %86 = math.exp %85 : vector<8x8xf32>
    %cst_53 = arith.constant dense<0.000000e+00> : vector<8xf32>
    %87 = vector.multi_reduction <add>, %86, %cst_53 [1] : vector<8x8xf32> to vector<8xf32>
    %88 = vector.shape_cast %87 : vector<8xf32> to vector<8x1xf32>
    %89 = tpu.reciprocal %88 : vector<8x1xf32> -> vector<8x1xf32>
    %90 = vector.broadcast %89 : vector<8x1xf32> to vector<8x8xf32>
    %91 = arith.mulf %86, %90 : vector<8x8xf32>
    %c0_54 = arith.constant 0 : index
    %c3 = arith.constant 3 : index
    %c0_55 = arith.constant 0 : index
    %c0_56 = arith.constant 0 : index
    %92 = vector.load %arg9[%c0_54, %c3, %c0_55, %c0_56] : memref<1x4x8x8xf32, #tpu.memory_space<vmem>>, vector<1x1x8x8xf32>
    %93 = vector.shape_cast %92 : vector<1x1x8x8xf32> to vector<8x8xf32>
    %94 = vector.shape_cast %91 : vector<8x8xf32> to vector<1x1x8x8xf32>
    tpu.vector_store %arg9[%c0_54, %c3, %c0_55, %c0_56], %94 {strides = array<i32>} : memref<1x4x8x8xf32, #tpu.memory_space<vmem>>, vector<1x1x8x8xf32>,
    %cst_57 = arith.constant dense<0.000000e+00> : vector<8x8xf32>
    %95 = tpu.matmul %91, %79, %cst_57 {dimension_numbers = #tpu.dot_dimension_numbers<[1], [0], [0], [1], [0, 0, 1, 1], [], []>} : vector<8x8xf32>, vector<8x8xf32>, vector<8x8xf32> -> vector<8x8xf32>
    %96 = tpu.concatenate %38, %57, %76, %95 in 1 : vector<8x8xf32>, vector<8x8xf32>, vector<8x8xf32>, vector<8x8xf32> -> vector<8x32xf32>
    %c0_58 = arith.constant 0 : index
    %c0_59 = arith.constant 0 : index
    %c0_60 = arith.constant 0 : index
    %97 = vector.load %arg8[%c0_58, %c0_59, %c0_60] : memref<1x8x32xf32, #tpu.memory_space<vmem>>, vector<1x8x32xf32>
    %98 = vector.shape_cast %97 : vector<1x8x32xf32> to vector<8x32xf32>
    %99 = vector.shape_cast %96 : vector<8x32xf32> to vector<1x8x32xf32>
    tpu.vector_store %arg8[%c0_58, %c0_59, %c0_60], %99 {strides = array<i32>} : memref<1x8x32xf32, #tpu.memory_space<vmem>>, vector<1x8x32xf32>,
    return
  }
  func.func @transform_0(%arg0: i32, %arg1: i32) -> (i32, i32, i32) {
    %c0_i32 = arith.constant 0 : i32
    %c0_i32_0 = arith.constant 0 : i32
    %c0_i32_1 = arith.constant 0 : i32
    return %arg0, %c0_i32, %c0_i32_0 : i32, i32, i32
  }
  func.func @transform_1(%arg0: i32, %arg1: i32) -> (i32, i32) {
    %c0_i32 = arith.constant 0 : i32
    %c0_i32_0 = arith.constant 0 : i32
    %c0_i32_1 = arith.constant 0 : i32
    return %c0_i32, %c0_i32_0 : i32, i32
  }
  func.func @transform_2(%arg0: i32, %arg1: i32) -> (i32, i32) {
    %c0_i32 = arith.constant 0 : i32
    %c0_i32_0 = arith.constant 0 : i32
    %c0_i32_1 = arith.constant 0 : i32
    return %c0_i32, %c0_i32_0 : i32, i32
  }
  func.func @transform_3(%arg0: i32, %arg1: i32) -> (i32, i32) {
    %c0_i32 = arith.constant 0 : i32
    %c0_i32_0 = arith.constant 0 : i32
    %c0_i32_1 = arith.constant 0 : i32
    return %c0_i32, %c0_i32_0 : i32, i32
  }
  func.func @transform_4(%arg0: i32, %arg1: i32) -> (i32, i32) {
    %c0_i32 = arith.constant 0 : i32
    %c0_i32_0 = arith.constant 0 : i32
    %c0_i32_1 = arith.constant 0 : i32
    return %c0_i32, %c0_i32_0 : i32, i32
  }
  func.func @transform_5(%arg0: i32, %arg1: i32) -> (i32, i32, i32) {
    %c0_i32 = arith.constant 0 : i32
    %c0_i32_0 = arith.constant 0 : i32
    %c0_i32_1 = arith.constant 0 : i32
    return %arg0, %c0_i32, %c0_i32_0 : i32, i32, i32
  }
  func.func @transform_6(%arg0: i32, %arg1: i32) -> (i32, i32, i32) {
    %c0_i32 = arith.constant 0 : i32
    %c0_i32_0 = arith.constant 0 : i32
    return %arg0, %arg1, %c0_i32 : i32, i32, i32
  }
  func.func @transform_7(%arg0: i32, %arg1: i32) -> (i32, i32, i32, i32) {
    %c0_i32 = arith.constant 0 : i32
    %c0_i32_0 = arith.constant 0 : i32
    %c0_i32_1 = arith.constant 0 : i32
    return %arg0, %c0_i32, %arg1, %c0_i32_0 : i32, i32, i32, i32
  }
}

</mosaic_0001>

<bundles_post_ra>
// kernel: tpu_custom_call.1
= control target key start
LH: loop header
LB: loop body
LE: loop exit
PB: predicated region body
PF: predicated region fallthrough
CT: control target
= control target key end

     0   :  { %s2247_s0 = inlined_call_operand.hbm [shape: f32[2,8,32], index: 0, kind: input, shape index: {}]   ;;  %s2248_s1 = inlined_call_operand.hbm [shape: f32[32,32], index: 1, kind: input, shape index: {}]   ;;  %s2249_s2 = inlined_call_operand.vmem [shape: f32[1,32], index: 2, kind: input, shape index: {}]   ;;  %s2250_s3 = inlined_call_operand.hbm [shape: f32[32,64], index: 3, kind: input, shape index: {}]   ;;  %s2251_s4 = inlined_call_operand.vmem [shape: f32[1,64], index: 4, kind: input, shape index: {}]   ;;  %s2252_s5 = inlined_call_operand.vmem [shape: f32[2,1,8], index: 5, kind: input, shape index: {}]   ;;  %s2253_s6 = inlined_call_operand.hbm [shape: f32[2,8,32], index: 6, kind: output, shape index: {0}]   ;;  %s2254_s7 = inlined_call_operand.hbm [shape: f32[2,4,8,8], index: 7, kind: output, shape index: {1}]  }
   0x1   :  { %2259 = sst [smem:[#allocation18_spill]] %s2248_s1 }
   0x2   :  { %2260 = sst [smem:[#allocation19_spill]] %s2250_s3 }
   0x3   :  { %13 = vsyncpa [#allocation5], 0 }
   0x4   :  { %15 = vsyncpa [#allocation5 + $0x1], 0 }
   0x5   :  { %16 = vsyncpa [#allocation8], 0 }
   0x6   :  { %17 = vsyncpa [#allocation6], 0 }
   0x7   :  { %19 = vsyncpa [#allocation6 + $0x1], 0 }
   0x8   :  { %20 = vsyncpa [#allocation12], 0 }
   0x9   :  { %22 = vsyncpa [#allocation12 + $0x1], 0  ;;  %s1936_s24 = smov 0   ;;  %s1938_s25 = smov 0  }
   0xa   :  { %s1940_s26 = smov 0   ;;  %s1942_s27 = smov 0  }
   0xb   :  { %s1944_s28 = smov 0   ;;  %s1946_s29 = smov 0  }
   0xc LB: > { %s1431_s30 = sadd.s32 4294967295, %s1874_s29   ;;  %s1432_s8 = sadd.s32 4294967294, %s1874_s29   ;;  %s1874_s29 = sphi %s1946_s29, %s28_s29   ;;  %s1870_s28 = sphi %s1944_s28, %s2281_s28   ;;  %s1866_s27 = sphi %s1942_s27, %s2280_s27   ;;  %s1862_s26 = sphi %s1940_s26, %s2279_s26   ;;  %s1858_s25 = sphi %s1938_s25, %s2278_s25   ;;  %s1854_s24 = sphi %s1936_s24, %s2277_s24  }
   0xd   : > { %p60_p0 = scmp.ne.s32.totalorder %s1858_s25, %s1854_s24  ;;  %p1970_p1 = scmp.eq.s32.totalorder %s1431_s30, 0 }
   0xe   : > { %p1974_p2 = scmp.eq.s32.totalorder %s1431_s30, 1  ;;  %p202_p3 = scmp.eq.s32.totalorder %s1432_s8, 1 }
   0xf   : > { %s2261_s9 = scalar_select %p1970_p1, 1, 0 }
  0x10   : > { %p1980_p4 = por %p1970_p1, %p60_p0  ;;  %p1433_p5 = scmp.ge.s32.totalorder %s1874_s29, 1 }
  0x11   : > { %p1985_p6 = por %p202_p3, %p60_p0  ;;  %p237_p7 = scmp.lt.s32.totalorder %s1874_s29, 3 }
  0x12   : > { %s2263_s11 = scalar_select %p1980_p4, 1, 0 }
  0x13   : > { %s2264_s12 = scalar_select %p1985_p6, 1, 0 }
  0x14   : > { %p1990_p8 = pnand %p1433_p5, %p237_p7  ;;  %s1876_s14 = smov [#allocation7]  }
  0x15   : > { %s249_s15 = sshll.u32 %s1876_s14, 4  ;;  %s1877_s17 = smov [#allocation9]   ;;  %s250_s15 = int_to_ptr.vmem [resolvable:$true] %s249_s15 }
  0x16   : > { %p1575_p9 = pneg %p1990_p8  ;;  %s265_s18 = sshll.u32 %s1877_s17, 4  ;;  %s266_s18 = int_to_ptr.vmem [resolvable:$true] %s265_s18 }
  0x17   : > { %s1691_s19 = scalar_lea.vmem %s250_s15, 512  ;;  %p1699_p5 = scmp.lt.s32.totalorder %s250_s15, %s250_s15 }
  0x18   : > { %p1999_p11 = pnand %p1575_p9, %p1970_p1  ;;  %p1692_p13 = scmp.ne.s32.totalorder %s250_s15, %s1691_s19 }
  0x19   : > { %p1700_p7 = scmp.lt.s32.totalorder %s1691_s19, %s1691_s19 }
  0x1a   : > { %p1682_p12 = pneg %p1999_p11 }
  0x1b   : > { %p1701_p10 = por %p1700_p7, %p1699_p5 }
  0x1c   : > { %p1694_p0 = pnand %p1692_p13, %p1682_p12 }
  0x1e   : > { %p1695_p3 = pneg %p1694_p0 }
  0x20   : > { %p1702_p9 = pnand %p1701_p10, %p1695_p3 }
  0x22   : > { %1705 = shalt.err (!%p1702_p9)
}
  0x23   : > { %s1878_s20 = smov 128   ;;  %s1879_s21 = smov 8  }
  0x24   : > { %s2267_s1 = sld [smem:[#allocation18_spill]]  ;;  %s1717_s30 = scalar_lea.vmem %s266_s18, 512 }
  0x25   : > { %p1718_p6 = scmp.ne.s32.totalorder %s266_s18, %s1717_s30  ;;  %p1725_p1 = scmp.lt.s32.totalorder %s266_s18, %s266_s18 }
  0x26   : > { %p1726_p4 = scmp.lt.s32.totalorder %s1717_s30, %s1717_s30 }
  0x27   : > { %p1720_p13 = pnand %p1718_p6, %p1682_p12 }
  0x28   : > { %p1727_p5 = por %p1726_p4, %p1725_p1 }
  0x29   : > { %p1721_p0 = pneg %p1720_p13 }
  0x2a   : > { %1578 = dma.hbm_to_vmem [thread:$0]  (!%p1999_p11), %s2267_s1, 512, %s250_s15, [#allocation8], %s1878_s20, %s1878_s20, %s1879_s21  }
  0x2b   : > { %p1728_p10 = pnand %p1727_p5, %p1721_p0 }
  0x2d   : > { %1731 = shalt.err (!%p1728_p10)
}
  0x2e   : > { %s2268_s3 = sld [smem:[#allocation19_spill]]  ;;  %s40_s15 = sadd.s32 1, %s1870_s28 }
  0x2f   : > { %s47_s17 = sadd.s32 1, %s1862_s26  ;;  %p42_p1 = scmp.ge.s32.totalorder %s40_s15, 2 }
  0x30   : > { %p54_p4 = scmp.ne.s32.totalorder %s1862_s26, %s1858_s25  ;;  %p55_p6 = scmp.eq.s32.totalorder %s1874_s29, 0 }
  0x31   : > { %p1595_p12 = scmp.lt.s32.totalorder %s1874_s29, 2  ;;  %s2283_s15 = smov (%p42_p1, %s40_s15), 0 }
  0x32   : > { %2269 = sst [smem:[#allocation17_spill]] %s2283_s15  ;;  %p56_p3 = por %p55_p6, %p54_p4 }
  0x33   : > { %p2031_p7 = por %p1974_p2, %p54_p4  ;;  %s44_s19 = ssub.s32 %s1870_s28, %s2283_s15 }
  0x34   : > { %1581 = dma.hbm_to_vmem [thread:$0]  (!%p1999_p11), %s2268_s3, 512, %s266_s18, [#allocation8], %s1878_s20, %s1878_s20, %s1879_s21  }
  0x35   : > { %s282_s22 = sand.u32 1, %s1862_s26   ;;  %p45_p9 = scmp.eq.s32.totalorder %s44_s19, 0 }
  0x36   : > { %s1437_s18 = sshll.u32 %s282_s22, 3  ;;  %s1438_s20 = sshll.u32 %s1870_s28, 7 }
  0x37   : > { %s2040_s21 = scalar_select %p45_p9, %s1862_s26, %s47_s17  }
  0x38   : > { %s291_s8 = scalar_lea.hbm %s2247_s0, %s1438_s20  ;;  %s286_s14 = scalar_lea.vmem [#allocation4], %s1437_s18 }
  0x39   : > { %s293_s1 = sshll.u32 %s286_s14, 4  ;;  %p2047_p11 = pnand %p1595_p12, %p56_p3  ;;  %s294_s1 = int_to_ptr.vmem [resolvable:$true] %s293_s1 }
  0x3a   : > { %s283_s3 = scalar_lea.sflag [#allocation5], %s282_s22  ;;  %s1745_s19 = scalar_lea.vmem %s294_s1, 128 }
  0x3b   : > { %p1734_p2 = pneg %p2047_p11  ;;  %p1746_p13 = scmp.ne.s32.totalorder %s294_s1, %s1745_s19 }
  0x3c   : > { %s1880_s17 = smov [#allocation4]  }
  0x3d   : > { %p1748_p0 = pnand %p1746_p13, %p1734_p2  ;;  %s1750_s15 = sshll.u32 %s1880_s17, 4  ;;  %s1751_s15 = int_to_ptr.vmem [resolvable:$false] %s1750_s15 }
  0x3e   : > { %s1752_s20 = scalar_lea.vmem %s1751_s15, 256  ;;  %p1753_p10 = scmp.lt.s32.totalorder %s294_s1, %s1751_s15 }
  0x3f   : > { %p1749_p5 = pneg %p1748_p0  ;;  %p1754_p1 = scmp.lt.s32.totalorder %s1752_s20, %s1745_s19 }
  0x41   : > { %p1755_p4 = por %p1754_p1, %p1753_p10 }
  0x43   : > { %p1756_p6 = pnand %p1755_p4, %p1749_p5 }
  0x45   : > { %1759 = shalt.err (!%p1756_p6)
}
  0x46   : > { %1585 = dma.hbm_to_vmem [thread:$0]  (!%p2047_p11), %s291_s8, 128, %s294_s1, %s283_s3  }
  0x47   : > { %308 = sbr.rel (%p1990_p8) target bundleno = 1260 (0x4ec), region = 44  ;;  %s2058_s22 = sand.u32 (!%p1990_p8), 1, %s1858_s25  }
  0x48   : > { %s1440_s18 = sshll.u32 (!%p1990_p8), %s2058_s22, 3  ;;  %s311_s23 = scalar_lea.sflag (!%p1990_p8), [#allocation5], %s2058_s22 }
  0x49   : > { %s314_s15 = scalar_lea.vmem (!%p1990_p8), [#allocation4], %s1440_s18  ;;  %p2272_p12 = scmp.ne.s32.totalorder (!%p1990_p8), %s2263_s11, 0 }
  0x4c   : > { %1837 = dma.done.wait (%p2272_p12), %s311_s23, 128  }
  0x4d   : > { %1839 = vsyncadd (%p2272_p12), %s311_s23, 4294967168  ;;  %p2273_p3 = scmp.ne.s32.totalorder %s2261_s9, 0 }
  0x4f   : > { %1841 = dma.done.wait (%p2273_p3), [#allocation8], 1024  }
  0x50   : > { %1843 = vsyncadd (%p2273_p3), [#allocation8], 4294966272  ;;  %v1881_v0 = vmov 0.0   ;;  %vm1882_vm0 = vmmov 0   ;;  %v372_v1 = vld [vmem:[#allocation9 + $0x18] sm:$0xff]  ;;  %v371_v3 = vld [vmem:[#allocation9 + $0x10] sm:$0xff] }
  0x51   : > { %1499 = vmatprep.subr.mxu0 %v1881_v0  ;;  %1510 = vmatprep.subr.mxu1 %v1881_v0  ;;  %v462_v2 = vld [vmem:[#allocation7 + $0x18] sm:$0xff]  ;;  %v461_v4 = vld [vmem:[#allocation7 + $0x10] sm:$0xff]  ;;  %v370_v5 = vld [vmem:[#allocation9 + $0x8] sm:$0xff]  ;;  %vm380_vm1 = vcmask 261120   ;;  %vm454_vm2 = vcmask 523264   ;;  %vm555_vm3 = vcmask 64512  }
  0x52   : > { %1507 = vmatprep.mubr.msk.f32.mxu0 %vm1882_vm0, %v1881_v0  ;;  %1518 = vmatprep.mubr.msk.f32.mxu1 %vm1882_vm0, %v1881_v0  ;;  %v460_v6 = vld [vmem:[#allocation7 + $0x8] sm:$0xff]  ;;  %v369_v7 = vld [vmem:[#allocation9] sm:$0xff]  ;;  %v368_v9 = vld [vmem:[%s314_s15] sm:$0xff]  ;;  %s1883_s13 = smov 112   ;;  %s1884_s30 = smov 120  }
  0x53   : > { %1500 = vmatpush3.msra.mxu0 %v372_v1  ;;  %1511 = vmatpush3.msra.mxu1 %v462_v2  ;;  %v459_v8 = vld [vmem:[#allocation7] sm:$0xff]  ;;  %s1885_s8 = smov 104   ;;  %p361_p8 = scmp.lt.s32.totalorder %s1866_s27, 1 }
  0x54   : > { %1501 = vmatprep.subr.mxu0 %v1881_v0  ;;  %1512 = vmatprep.subr.mxu1 %v1881_v0  ;;  %v1445_v10 = vld [vmem:[%s2251_s4] ss:$0 sm:$0xff]  ;;  %s1886_s20 = smov 96   ;;  %s1887_s23 = smov 80  }
  0x55   : > { %1502 = vmatpush3.msra.mxu0 %v371_v3  ;;  %1513 = vmatpush3.msra.mxu1 %v461_v4  ;;  %v1447_v11 = vld [vmem:[%s2249_s2] ss:$0 sm:$0xff]  ;;  %s362_s14 = scalar_select %p361_p8, %s1866_s27, 1 }
  0x56   : > { %1503 = vmatprep.subr.mxu0 %v1881_v0  ;;  %1514 = vmatprep.subr.mxu1 %v1881_v0  ;;  %s1888_s15 = smov 72   ;;  %s1889_s1 = smov 88  }
  0x57   : > { %1504 = vmatpush3.msra.mxu0 %v370_v5  ;;  %1515 = vmatpush3.msra.mxu1 %v460_v6  ;;  %s363_s17 = scalar_lea.vmem %s2252_s5, %s362_s14  ;;  %s1444_s3 = sshll.u32 %s2058_s22, 5 }
  0x58   : > { %1505 = vmatprep.subr.mxu0 %v1881_v0  ;;  %1516 = vmatprep.subr.mxu1 %v1881_v0  ;;  %v1449_v27 = vld [vmem:[%s363_s17] ss:$0 sm:$0xff]  ;;  %s2141_s9 = scalar_lea.vmem [#allocation11], %s1444_s3  ;;  %s1472_s11 = sshll.u32 %s1866_s27, 9 }
  0x59   : > { %1506 = vmatpush3.msra.mxu0 %v369_v7  ;;  %1517 = vmatpush3.msra.mxu1 %v459_v8  ;;  %s2169_s10 = scalar_lea.hbm %s2254_s7, %s1472_s11  ;;  %s1257_s19 = scalar_lea.sflag [#allocation12], %s2058_s22 }
  0x5a   : > { %1508 = vmatmul.mubr.msk.f32.vlgmr.msra.gmra.mxu0 %vm380_vm1, %v368_v9  ;;  %1519 = vmatmul.mubr.msk.f32.vlgmr.msra.gmra.mxu1 %vm380_vm1, %v368_v9 }
  0x5b   : > { %1521 = vmatprep.subr.mxu0 %v1881_v0  ;;  %1523 = vmatprep.mubr.msk.f32.mxu0 %vm1882_vm0, %v1881_v0 }
  0x5c   : > { %1526 = vmatprep.subr.mxu1 %v1881_v0  ;;  %1528 = vmatprep.mubr.msk.f32.mxu1 %vm1882_vm0, %v1881_v0 }
 0x11a   : > { %v450_v12 = vpop.f32.mrf.mxu0  ;;  %v540_v13 = vpop.f32.mrf.mxu1 }
 0x11b   : > { %v451_v14 = vadd.f32 %v1445_v10, %v450_v12  ;;  %v541_v15 = vadd.f32 %v1447_v11, %v540_v13 }
 0x11c   : > { %v1509_v16 = vpop.f32.mrf.mxu0  ;;  %v1520_v17 = vpop.f32.mrf.mxu1 }
 0x11d   : > { %455 = vst.msk [vmem:[#allocation3] sm:$0xff] %vm454_vm2, %v451_v14  ;;  %v544_v18 = vmul.f32 0.35355338, %v541_v15 }
 0x11f   : > { %545 = vst.msk [vmem:[#allocation2] sm:$0xff] %vm380_vm1, %v544_v18 }
 0x124   : > { %v2099_v19 = vld [vmem:[#allocation3] sm:$0xff] }
 0x125   : > { %897 = vrot.lane.b32.xlu1 %v2099_v19, %s1883_s13  ;;  %726 = vrot.lane.b32.xlu0 %v2099_v19, %s1884_s30 }
 0x126   : > { %1522 = vmatpush3.xpose.msk.msra.mxu0 %vm555_vm3, %v2099_v19  ;;  %v553_v20 = vld [vmem:[#allocation2] sm:$0xff] }
 0x127   : > { %1531 = vmatprep.subr.mxu0 %v1881_v0 }
 0x129   : > { %1524 = vmatmul.mubr.msk.f32.vlgmr.msra.gmra.mxu0 %vm555_vm3, %v553_v20  ;;  %894 = vrot.lane.b32.xlu1 %v553_v20, %s1883_s13  ;;  %s1285_s13 = sshll.u32 %s2141_s9, 4  ;;  %s2171_s13 = int_to_ptr.vmem [resolvable:$true] %s1285_s13 }
 0x12a   : > { %723 = vrot.lane.b32.xlu0 %v553_v20, %s1884_s30  ;;  %1533 = vmatprep.mubr.msk.f32.mxu0 %vm1882_vm0, %v1881_v0  ;;  %s1890_s30 = smov 8   ;;  %s1760_s17 = scalar_lea.vmem %s2171_s13, 512 }
 0x12b   : > { %p1761_p9 = scmp.ne.s32.totalorder %s2171_s13, %s1760_s17 }
 0x12d   : > { %1065 = vrot.lane.b32.xlu1 %v553_v20, %s1885_s8  ;;  %p1762_p11 = pnand %p1761_p9, %p2031_p7 }
 0x12e   : > { %1068 = vrot.lane.b32.xlu0 %v2099_v19, %s1885_s8 }
 0x12f   : > { %p1763_p2 = pneg %p1762_p11 }
 0x197   : > { %v727_v21 = vpop.permute.xlu0 %726  ;;  %v898_v22 = vpop.permute.xlu1 %897 }
 0x198   : > { %1532 = vmatpush3.xpose.msk.msra.mxu0 %vm555_vm3, %v727_v21 }
 0x199   : > { %1541 = vmatprep.subr.mxu0 %v1881_v0 }
 0x19b   : > { %v895_v24 = vpop.permute.xlu1 %894 }
 0x19c   : > { %v724_v23 = vpop.permute.xlu0 %723 }
 0x19d   : > { %1534 = vmatmul.mubr.msk.f32.vlgmr.msra.gmra.mxu0 %vm555_vm3, %v724_v23 }
 0x19e   : > { %1542 = vmatpush3.xpose.msk.msra.mxu0 %vm555_vm3, %v898_v22  ;;  %1543 = vmatprep.mubr.msk.f32.mxu0 %vm1882_vm0, %v1881_v0 }
 0x19f   : > { %1551 = vmatprep.subr.mxu0 %v1881_v0  ;;  %v1066_v26 = vpop.permute.xlu1 %1065 }
 0x1a0   : > { %v1069_v25 = vpop.permute.xlu0 %1068 }
 0x1a1   : > { %1544 = vmatmul.mubr.msk.f32.vlgmr.msra.gmra.mxu0 %vm555_vm3, %v895_v24 }
 0x1a2   : > { %1552 = vmatpush3.xpose.msk.msra.mxu0 %vm555_vm3, %v1069_v25  ;;  %1553 = vmatprep.mubr.msk.f32.mxu0 %vm1882_vm0, %v1881_v0 }
 0x1a5   : > { %1554 = vmatmul.mubr.msk.f32.vlgmr.msra.gmra.mxu0 %vm555_vm3, %v1066_v26 }
 0x1e9   : > { %v628_v28 = vpop.f32.mrf.mxu0 }
 0x1ea   : > { %v629_v29 = vadd.f32 %v1449_v27, %v628_v28 }
 0x1eb   : > { %v1525_v30 = vpop.f32.mrf.mxu0 }
 0x1ec   : > { %v632_v31 = vsel %vm555_vm3, %v629_v29, -inf }
 0x1ed   : > { %633 = vmax.xlane.f32.xlu0 %v632_v31 }
 0x25d   : > { %v798_v32 = vpop.f32.mrf.mxu0 }
 0x25e   : > { %v799_v33 = vadd.f32 %v1449_v27, %v798_v32 }
 0x25f   : > { %v1535_v34 = vpop.f32.mrf.mxu0 }
 0x260   : > { %v802_v35 = vsel %vm555_vm3, %v799_v33, -inf }
 0x261   : > { %803 = vmax.xlane.f32.xlu1 %v802_v35  ;;  %v969_v36 = vpop.f32.mrf.mxu0 }
 0x262   : > { %v970_v37 = vadd.f32 %v1449_v27, %v969_v36 }
 0x263   : > { %v1545_v38 = vpop.f32.mrf.mxu0 }
 0x264   : > { %v973_v39 = vsel %vm555_vm3, %v970_v37, -inf }
 0x265   : > { %974 = vmax.xlane.f32.xlu0 %v973_v39  ;;  %v1140_v40 = vpop.f32.mrf.mxu0 }
 0x266   : > { %v1141_v41 = vadd.f32 %v1449_v27, %v1140_v40 }
 0x267   : > { %v1555_v42 = vpop.f32.mrf.mxu0 }
 0x268   : > { %v1144_v43 = vsel %vm555_vm3, %v1141_v41, -inf }
 0x269   : > { %1145 = vmax.xlane.f32.xlu0 %v1144_v43 }
 0x272   : > { %644 = vrot.lane.b32.xlu1 %v2099_v19, %s1886_s20  ;;  %s1891_s20 = smov [#allocation11]  }
 0x276   : > { %v634_v44 = vpop.xlane.xlu0 %633 }
 0x277   : > { %v635_v45 = vsub.f32 %v629_v29, %v634_v44 }
 0x279   : > { %v636_v46 = vmul.f32 1.442695, %v635_v45 }
 0x27b   : > { %1664 = vpow2.f32 %v636_v46 }
 0x288   : > { %v1665_v47 = vpop.eup %1664 }
 0x289   : > { %v638_v48 = vsel %vm555_vm3, %v1665_v47, 0.0 }
 0x296   : > { %639 = vadd.xlane.f32.xlu1 %v638_v48 }
 0x2ea   : > { %v804_v49 = vpop.xlane.xlu1 %803 }
 0x2eb   : > { %v805_v50 = vsub.f32 %v799_v33, %v804_v49 }
 0x2ed   : > { %v806_v51 = vmul.f32 1.442695, %v805_v50 }
 0x2ee   : > { %v645_v52 = vpop.permute.xlu1 %644  ;;  %v975_v53 = vpop.xlane.xlu0 %974 }
 0x2ef   : > { %1666 = vpow2.f32 %v806_v51  ;;  %v976_v54 = vsub.f32 %v970_v37, %v975_v53  ;;  %1527 = vmatpush3.msra.mxu1 %v645_v52 }
 0x2f0   : > { %1536 = vmatprep.subr.mxu1 %v1881_v0 }
 0x2f1   : > { %v977_v55 = vmul.f32 1.442695, %v976_v54 }
 0x2f2   : > { %v1146_v56 = vpop.xlane.xlu0 %1145 }
 0x2f3   : > { %1668 = vpow2.f32 %v977_v55  ;;  %v1147_v57 = vsub.f32 %v1141_v41, %v1146_v56 }
 0x2f5   : > { %v1148_v58 = vmul.f32 1.442695, %v1147_v57 }
 0x2f7   : > { %1670 = vpow2.f32 %v1148_v58 }
 0x2fc   : > { %v1667_v59 = vpop.eup %1666 }
 0x2fd   : > { %v808_v60 = vsel %vm555_vm3, %v1667_v59, 0.0 }
 0x2fe   : > { %809 = vadd.xlane.f32.xlu0 %v808_v60 }
 0x300   : > { %v1669_v61 = vpop.eup %1668 }
 0x301   : > { %v979_v62 = vsel %vm555_vm3, %v1669_v61, 0.0 }
 0x302   : > { %980 = vadd.xlane.f32.xlu1 %v979_v62 }
 0x304   : > { %v1671_v63 = vpop.eup %1670 }
 0x305   : > { %v1150_v1 = vsel %vm555_vm3, %v1671_v63, 0.0 }
 0x306   : > { %1151 = vadd.xlane.f32.xlu0 %v1150_v1 }
 0x313   : > { %986 = vrot.lane.b32.xlu1 %v2099_v19, %s1887_s23  ;;  %s1764_s23 = sshll.u32 %s1891_s20, 4  ;;  %s1765_s23 = int_to_ptr.vmem [resolvable:$false] %s1764_s23 }
 0x314   : > { %p1767_p13 = scmp.lt.s32.totalorder %s2171_s13, %s1765_s23 }
 0x317   : > { %1157 = vrot.lane.b32.xlu1 %v2099_v19, %s1888_s15  ;;  %s1766_s15 = scalar_lea.vmem %s1765_s23, 1024 }
 0x318   : > { %p1768_p0 = scmp.lt.s32.totalorder %s1766_s15, %s1760_s17 }
 0x31a   : > { %p1769_p5 = por %p1768_p0, %p1767_p13 }
 0x31c   : > { %815 = vrot.lane.b32.xlu0 %v2099_v19, %s1889_s1  ;;  %p1770_p10 = pnand %p1769_p5, %p1763_p2 }
 0x31f   : > { %v640_v2 = vpop.xlane.xlu1 %639 }
 0x320   : > { %1672 = vrcp.f32 %v640_v2 }
 0x32d   : > { %v1673_v3 = vpop.eup %1672 }
 0x32e   : > { %v642_v4 = vmul.f32 %v1673_v3, %v1665_v47 }
 0x330   : > { %643 = vst.msk [vmem:[%s2141_s9] sm:$0xff] %vm555_vm3, %v642_v4  ;;  %1529 = vmatmul.mubr.msk.f32.vlgmr.msra.gmra.mxu1 %vm555_vm3, %v642_v4 }
 0x331   : > { %1538 = vmatprep.mubr.msk.f32.mxu1 %vm1882_vm0, %v1881_v0 }
 0x387   : > { %v810_v5 = vpop.xlane.xlu0 %809 }
 0x388   : > { %1674 = vrcp.f32 %v810_v5 }
 0x38b   : > { %v981_v6 = vpop.xlane.xlu1 %980 }
 0x38c   : > { %1676 = vrcp.f32 %v981_v6 }
 0x38f   : > { %v1152_v7 = vpop.xlane.xlu0 %1151  ;;  %v987_v10 = vpop.permute.xlu1 %986 }
 0x390   : > { %1678 = vrcp.f32 %v1152_v7 }
 0x393   : > { %v816_v8 = vpop.permute.xlu0 %815  ;;  %v1158_v14 = vpop.permute.xlu1 %1157 }
 0x394   : > { %1537 = vmatpush3.msra.mxu1 %v816_v8 }
 0x395   : > { %v1675_v9 = vpop.eup %1674  ;;  %1546 = vmatprep.subr.mxu1 %v1881_v0 }
 0x396   : > { %v812_v11 = vmul.f32 %v1675_v9, %v1667_v59 }
 0x398   : > { %1455 = vst.msk [vmem:[%s2141_s9 + $0x8] sm:$0xff] %vm555_vm3, %v812_v11  ;;  %1539 = vmatmul.mubr.msk.f32.vlgmr.msra.gmra.mxu1 %vm555_vm3, %v812_v11 }
 0x399   : > { %v1677_v12 = vpop.eup %1676  ;;  %1547 = vmatpush3.msra.mxu1 %v987_v10  ;;  %1548 = vmatprep.mubr.msk.f32.mxu1 %vm1882_vm0, %v1881_v0 }
 0x39a   : > { %1556 = vmatprep.subr.mxu1 %v1881_v0  ;;  %v983_v13 = vmul.f32 %v1677_v12, %v1669_v61 }
 0x39c   : > { %1459 = vst.msk [vmem:[%s2141_s9 + $0x10] sm:$0xff] %vm555_vm3, %v983_v13  ;;  %1549 = vmatmul.mubr.msk.f32.vlgmr.msra.gmra.mxu1 %vm555_vm3, %v983_v13 }
 0x39d   : > { %v1679_v15 = vpop.eup %1678  ;;  %1557 = vmatpush3.msra.mxu1 %v1158_v14  ;;  %1558 = vmatprep.mubr.msk.f32.mxu1 %vm1882_vm0, %v1881_v0 }
 0x39e   : > { %v1154_v16 = vmul.f32 %v1679_v15, %v1671_v63 }
 0x3a0   : > { %1463 = vst.msk [vmem:[%s2141_s9 + $0x18] sm:$0xff] %vm555_vm3, %v1154_v16  ;;  %1559 = vmatmul.mubr.msk.f32.vlgmr.msra.gmra.mxu1 %vm555_vm3, %v1154_v16 }
 0x3f0   : > { %v716_v17 = vpop.f32.mrf.mxu1 }
 0x3f2   : > { %v1530_v18 = vpop.f32.mrf.mxu1 }
 0x458   : > { %v887_v19 = vpop.f32.mrf.mxu1 }
 0x459   : > { %1234 = vrot.lane.b32.xlu0 %v887_v19, %s1890_s30 }
 0x45a   : > { %v1540_v0 = vpop.f32.mrf.mxu1 }
 0x45b   : > { %1773 = shalt.err (!%p1770_p10)
}
 0x45c   : > { %s1774_s1 = scalar_lea.hbm %s2169_s10, 512  ;;  %s1778_s11 = scalar_lea.hbm %s2254_s7, 1024 }
 0x45d   : > { %p1775_p1 = scmp.ne.s32.totalorder %s2169_s10, %s1774_s1  ;;  %p1779_p12 = scmp.lt.s32.totalorder %s2169_s10, %s2254_s7 }
 0x45e   : > { %p1780_p3 = scmp.lt.s32.totalorder %s1778_s11, %s1774_s1 }
 0x45f   : > { %p1776_p4 = pnand %p1775_p1, %p2031_p7 }
 0x460   : > { %p1781_p8 = por %p1780_p3, %p1779_p12 }
 0x461   : > { %p1777_p6 = pneg %p1776_p4 }
 0x463   : > { %p1782_p9 = pnand %p1781_p8, %p1777_p6 }
 0x465   : > { %1785 = shalt.err (!%p1782_p9)
}
 0x466   : > { %s1892_s17 = smov 128   ;;  %v1058_v20 = vpop.f32.mrf.mxu1  ;;  %s1893_s20 = smov 16   ;;  %vm1246_vm4 = vcmask 130048   ;;  %vm1248_vm5 = vcmask 195584  }
 0x467   : > { %1572 = dma.vmem_to_hbm [thread:$0]  (%p2031_p7), %s2171_s13, 512, %s2169_s10, %s1257_s19, %s1892_s17, %s1892_s17, %s1890_s30  }
 0x468   : > { %1238 = vrot.lane.b32.xlu1 %v1058_v20, %s1893_s20  ;;  %v1550_v21 = vpop.f32.mrf.mxu1  ;;  %s1894_s23 = smov 24   ;;  %s1467_s15 = sshll.u32 %s1866_s27, 7 }
 0x469   : > { %s353_s1 = scalar_lea.vmem [#allocation10], %s1440_s18  ;;  %s2204_s10 = scalar_lea.hbm %s2253_s6, %s1467_s15 }
 0x46a   : > { %v1229_v22 = vpop.f32.mrf.mxu1  ;;  %s1271_s3 = sshll.u32 %s353_s1, 4  ;;  %s1252_s19 = scalar_lea.sflag [#allocation6], %s2058_s22  ;;  %s1272_s3 = int_to_ptr.vmem [resolvable:$true] %s1271_s3 }
 0x46b   : > { %1242 = vrot.lane.b32.xlu0 %v1229_v22, %s1894_s23  ;;  %s1786_s9 = scalar_lea.vmem %s1272_s3, 128  ;;  %s1895_s27 = smov [#allocation10]  }
 0x46c   : > { %v1560_v23 = vpop.f32.mrf.mxu1  ;;  %p1787_p11 = scmp.ne.s32.totalorder %s1272_s3, %s1786_s9  ;;  %s1790_s18 = sshll.u32 %s1895_s27, 4  ;;  %s1791_s18 = int_to_ptr.vmem [resolvable:$false] %s1790_s18 }
 0x46d   : > { %s1792_s11 = scalar_lea.vmem %s1791_s18, 256  ;;  %p1793_p0 = scmp.lt.s32.totalorder %s1272_s3, %s1791_s18 }
 0x46e   : > { %p1788_p2 = pnand %p1787_p11, %p2031_p7  ;;  %p1794_p5 = scmp.lt.s32.totalorder %s1792_s11, %s1786_s9 }
 0x470   : > { %p1789_p13 = pneg %p1788_p2  ;;  %p1795_p10 = por %p1794_p5, %p1793_p0 }
 0x472   : > { %p1796_p1 = pnand %p1795_p10, %p1789_p13 }
 0x4cb   : > { %v1235_v24 = vpop.permute.xlu0 %1234 }
 0x4cc   : > { %v1245_v26 = vsel %vm555_vm3, %v716_v17, %v1235_v24 }
 0x4da   : > { %v1239_v25 = vpop.permute.xlu1 %1238 }
 0x4db   : > { %v1247_v27 = vsel %vm1246_vm4, %v1245_v26, %v1239_v25 }
 0x4dd   : > { %v1243_v28 = vpop.permute.xlu0 %1242 }
 0x4de   : > { %v1249_v29 = vsel %vm1248_vm5, %v1247_v27, %v1243_v28 }
 0x4df   : > { %1250 = vst.msk [vmem:[%s353_s1] sm:$0xff] %vm380_vm1, %v1249_v29 }
 0x4e0   : > { %1799 = shalt.err (!%p1796_p1)
}
 0x4e1   : > { %s1800_s8 = scalar_lea.hbm %s2204_s10, 128  ;;  %s1804_s17 = scalar_lea.hbm %s2253_s6, 256 }
 0x4e2   : > { %p1801_p4 = scmp.ne.s32.totalorder %s2204_s10, %s1800_s8  ;;  %p1805_p3 = scmp.lt.s32.totalorder %s2204_s10, %s2253_s6 }
 0x4e3   : > { %p1806_p8 = scmp.lt.s32.totalorder %s1804_s17, %s1800_s8 }
 0x4e4   : > { %p1802_p6 = pnand %p1801_p4, %p2031_p7 }
 0x4e5   : > { %p1807_p9 = por %p1806_p8, %p1805_p3 }
 0x4e6   : > { %p1803_p12 = pneg %p1802_p6 }
 0x4e8   : > { %p1808_p11 = pnand %p1807_p9, %p1803_p12 }
 0x4ea   : > { %1811 = shalt.err (!%p1808_p11)
}
 0x4eb   : > { %1571 = dma.vmem_to_hbm [thread:$0]  (%p2031_p7), %s1272_s3, 128, %s2204_s10, %s1252_s19  }
 0x4ec PF: > { %s1300_s15 = sand.u32 1, %s1854_s24   ;;  %p2274_p2 = scmp.ne.s32.totalorder %s2264_s12, 0 }
 0x4ed   : > { %p2275_p13 = scmp.ge.s32.totalorder %s1874_s29, 2  ;;  %s1301_s1 = scalar_lea.sflag [#allocation6], %s1300_s15 }
 0x4ef   : > { %p1587_p0 = pnand %p2275_p13, %p2274_p2 }
 0x4f1   : > { %p1588_p5 = pneg %p1587_p0 }
 0x4f3   : > { %1845 = dma.done.wait (%p1588_p5), %s1301_s1, 128  }
 0x4f4   : > { %1847 = vsyncadd (%p1588_p5), %s1301_s1, 4294967168  ;;  %s1310_s13 = scalar_lea.sflag [#allocation12], %s1300_s15 }
 0x4f5   : > { %1849 = dma.done.wait (%p1588_p5), %s1310_s13, 512  }
 0x4f6   : > { %1851 = vsyncadd (%p1588_p5), %s1310_s13, 4294966784  ;;  %s28_s29 = sadd.s32 1, %s1874_s29   ;;  %s2276_s16 = sld [smem:[#allocation17_spill]] }
 0x4f7   : > { %p25_p10 = scmp.ge.s32.totalorder %s28_s29, 4   ;;  %s2277_s24 = smov %s1858_s25 }
 0x4f8   : > { %s2278_s25 = smov %s1862_s26  ;;  %s2279_s26 = smov %s2040_s21 }
 0x4f9   : > { %s2280_s27 = smov %s1870_s28  ;;  %27 = sbr.rel (!%p25_p10) target bundleno = 12 (0xc), region = 125 }
 0x4fc   : > { %s2281_s28 = smov %s2276_s16 }
 0x4fe   :  { %1315 = vsyncpa [#allocation5], 1 }
 0x4ff   :  { %1317 = vsyncpa [#allocation5 + $0x1], 1 }
 0x500   :  { %1318 = vsyncpa [#allocation8], 1 }
 0x501   :  { %1319 = vsyncpa [#allocation6], 1 }
 0x502   :  { %1321 = vsyncpa [#allocation6 + $0x1], 1 }
 0x503   :  { %1322 = vsyncpa [#allocation12], 1 }
 0x504   :  { %1324 = vsyncpa [#allocation12 + $0x1], 1 }

</bundles_post_ra>
